<compile_context>
chip_gen: v5e
topology: v5e:2x2
jax: 0.10.0
libtpu: 0.0.40
codegen_flags: <defaults>
</compile_context>

<pallas_src>
import functools
import math

import jax
import jax.numpy as jnp
from jax.experimental import pallas as pl
from jax.experimental.pallas import tpu as pltpu


_LANE = 128


def _round_up(n, m):
    return (n + m - 1) // m * m


# ---------------------------------------------------------------------------
# Pallas kernel: one fused matmul + elementwise sin*exp epilogue per batch tile.
# ---------------------------------------------------------------------------
def _herglotz_kernel(x_ref, a_ref, out_ref, *, ap, bf16_epilogue):
    # x_ref:  (TB, D+1)     f32   (last column is ones -> bias row of a_ref)
    # a_ref:  (D+1, 2*Ap)   f32   [real+b_R_eff half | imag+b_I half]
    # out:    (TB, Ap)      out_ref.dtype
    z = jnp.dot(x_ref[...], a_ref[...], preferred_element_type=jnp.float32)
    zr = z[:, :ap]          # static, 128-aligned slices
    zi = z[:, ap:]
    if bf16_epilogue:
        # v6e/v7x only: 2x EUP throughput for the two transcendentals.
        zr = zr.astype(jnp.bfloat16)
        zi = zi.astype(jnp.bfloat16)
    out_ref[...] = (jnp.sin(zi) * jnp.exp(zr)).astype(out_ref.dtype)


# ---------------------------------------------------------------------------
# One-time parameter packing into kernel-ready layout.
# ---------------------------------------------------------------------------
def pack_herglotz_params(a_real, a_imag, w_r, b_i, b_r, scalars):
    """a_real/a_imag: (A, D); w_r/b_i/b_r: (A,); scalars: [1/rref, 1/varpi0, norm_const].

    Returns a single (D+1, 2*Ap) f32 matrix with all scalar factors and biases
    folded in; Ap = round_up(A, 128) (padded lanes produce sin(0)*exp(0)=0).
    """
    num_atoms, _ = a_real.shape
    rref_inv, varpi0_inv, norm_const = scalars[0], scalars[1], scalars[2]

    w_eff = w_r * varpi0_inv * rref_inv                       # (A,)
    ap = _round_up(num_atoms, _LANE)
    pad_a = ap - num_atoms

    ar_s = jnp.pad((a_real * w_eff[:, None]).T, ((0, 0), (0, pad_a)))   # (D, Ap)
    ai_s = jnp.pad((a_imag * w_eff[:, None]).T, ((0, 0), (0, pad_a)))   # (D, Ap)

    b_r_eff = jnp.pad(b_r - w_r * varpi0_inv * norm_const, (0, pad_a))  # (Ap,)
    b_i_p = jnp.pad(b_i, (0, pad_a))                                    # (Ap,)

    a_top = jnp.concatenate([ar_s, ai_s], axis=1)                       # (D, 2Ap)
    bias_row = jnp.concatenate([b_r_eff, b_i_p])[None, :]               # (1, 2Ap)
    a_packed = jnp.concatenate([a_top, bias_row], axis=0)               # (D+1, 2Ap)
    return a_packed.astype(jnp.float32)


# ---------------------------------------------------------------------------
# Tile selection: amortize per-step overhead, respect VMEM, feed both v7x TCs.
# ---------------------------------------------------------------------------
def _choose_tb(b, ap, dk):
    budget = 16 << 20                        # f32 tile bytes per grid step
    per_row = 16 * ap + 8 * dk               # out(x2) + z + x(x2), bytes/row
    tb_cap = min(2048, max(8, (budget // per_row) // 8 * 8))
    # v7x megacore: keep >= 2 parallel grid steps once each half is sizable.
    if b >= 1024:
        tb_cap = min(tb_cap, _round_up(-(-b // 2), 8))
    tb = min(tb_cap, _round_up(b, 8))
    # Prefer a tile that divides b exactly (no pad copy), but never shrink
    # below half the overhead-amortizing tile size for it.
    if b % 8 == 0 and b > tb:
        for cand in range(tb, max(tb // 2, 7), -8):
            if b % cand == 0:
                return cand
    return tb


# ---------------------------------------------------------------------------
# Forward wrapper: batch-tiled pallas_call.
# ---------------------------------------------------------------------------
@functools.partial(jax.jit, static_argnames=("num_atoms", "out_dtype", "bf16_epilogue"))
def herglotz_pe_forward(x, a_packed, *, num_atoms, out_dtype=jnp.float32,
                        bf16_epilogue=False):
    """x: (B, D) f32; a_packed from pack_herglotz_params; returns (B, num_atoms)."""
    b, d = x.shape
    dk = a_packed.shape[0]            # D + 1
    ap = a_packed.shape[1] // 2
    assert dk == d + 1

    # Fold biases into the matmul via a ones column (x is tiny, D << Ap).
    x_aug = jnp.concatenate([x, jnp.ones((b, 1), x.dtype)], axis=1)

    tb = _choose_tb(b, ap, dk)
    b_pad = _round_up(b, tb)
    if b_pad != b:
        x_aug = jnp.pad(x_aug, ((0, b_pad - b), (0, 0)))

    # Per-step VMEM: x (x2) + out (x2) + z intermediate + weights (x2).
    vmem_need = 4 * (2 * tb * dk + 2 * tb * ap + 2 * tb * ap + 2 * dk * 2 * ap)
    vmem_limit = int(min(max(vmem_need + (8 << 20), 32 << 20), 56 << 20))

    out = pl.pallas_call(
        functools.partial(_herglotz_kernel, ap=ap, bf16_epilogue=bf16_epilogue),
        out_shape=jax.ShapeDtypeStruct((b_pad, ap), out_dtype),
        grid=(b_pad // tb,),
        in_specs=[
            pl.BlockSpec((tb, dk), lambda i: (i, 0)),        # batch-tiled, pipelined
            pl.BlockSpec((dk, 2 * ap), lambda i: (0, 0)),    # weights: VMEM resident
        ],
        out_specs=pl.BlockSpec((tb, ap), lambda i: (i, 0)),  # lane-dense output
        compiler_params=pltpu.CompilerParams(
            dimension_semantics=("parallel",),
            vmem_limit_bytes=vmem_limit,
        ),
    )(x_aug, a_packed)
    # TODO(synk): downstream consumers could accept the lane-padded atom axis
    # to avoid this extra output pass; kept to preserve module semantics.
    return out[:b, :num_atoms]


# ---------------------------------------------------------------------------
# Deterministic parameter init (mirrors HerglotzPE.__init__ semantics).
# ---------------------------------------------------------------------------
def _generate_herglotz_vector(key, dim):
    k1, k2 = jax.random.split(key)
    a_r = jax.random.normal(k1, (dim,), jnp.float32)
    a_r = a_r / (jnp.sqrt(2.0) * jnp.linalg.norm(a_r))
    a_i = jax.random.normal(k2, (dim,), jnp.float32)
    a_i = a_i - 2.0 * jnp.dot(a_i, a_r) * a_r
    a_i = a_i / (jnp.sqrt(2.0) * jnp.linalg.norm(a_i))
    return a_r, a_i


def init_herglotz_pe(key, num_atoms, input_dim, *, rref=1.0, varpi0=1.0,
                     init_exponents=True, normalize=True):
    keys = jax.random.split(key, num_atoms)
    vecs = [_generate_herglotz_vector(k, input_dim) for k in keys]
    a_real = jnp.stack([v[0] for v in vecs], axis=0)          # (A, D)
    a_imag = jnp.stack([v[1] for v in vecs], axis=0)          # (A, D)

    if init_exponents:
        l_upper = math.ceil(math.sqrt(num_atoms)) - 1
        exps = [float(l) for l in range(l_upper + 1) for _ in range(2 * l + 1)]
        w_r = jnp.asarray(exps[:num_atoms], jnp.float32) / math.e
    else:
        w_r = jax.random.uniform(key, (num_atoms,), jnp.float32,
                                 -1.0 / input_dim, 1.0 / input_dim)

    b_i = jnp.zeros((num_atoms,), jnp.float32)
    b_r = jnp.zeros((num_atoms,), jnp.float32)
    norm_const = (1.0 / math.sqrt(2.0)) if normalize else 0.0
    scalars = jnp.asarray([1.0 / rref, 1.0 / varpi0, norm_const], jnp.float32)
    return a_real, a_imag, w_r, b_i, b_r, scalars


def _reference(x, a_real, a_imag, w_r, b_i, b_r, scalars):
    rref_inv, varpi0_inv, norm_const = scalars[0], scalars[1], scalars[2]
    ax_r = (x @ a_real.T) * rref_inv
    ax_i = (x @ a_imag.T) * rref_inv
    sin_term = jnp.sin(w_r * varpi0_inv * ax_i + b_i)
    exp_term = jnp.exp(w_r * varpi0_inv * (ax_r - norm_const) + b_r)
    return sin_term * exp_term


if __name__ == "__main__":
    key = jax.random.PRNGKey(0)
    k_param, k_x = jax.random.split(key)

    input_dim = 3
    L = 3
    num_atoms = (L + 1) ** 2     # 16
    batch = 8

    raw = init_herglotz_pe(k_param, num_atoms, input_dim)
    a_packed = pack_herglotz_params(*raw)
    x = jax.random.normal(k_x, (batch, input_dim), jnp.float32)

    out = herglotz_pe_forward(x, a_packed, num_atoms=num_atoms)
    out = jax.block_until_ready(out)

    ref = _reference(x, *raw)
    assert out.shape == (batch, num_atoms)
    assert jnp.allclose(out, ref, atol=1e-5, rtol=1e-5)
    print("KERNEL_OK")
</pallas_src>

<mosaic_0001>
module attributes {stable_mosaic.version = 11 : i64} {
  func.func @_herglotz_kernel(%arg0: i32, %arg1: memref<8x4xf32, #tpu.memory_space<vmem>>, %arg2: memref<4x256xf32, #tpu.memory_space<vmem>>, %arg3: memref<8x128xf32, #tpu.memory_space<vmem>>) attributes {dimension_semantics = [#tpu.dimension_semantics<parallel>], iteration_bounds = array<i64: 1>, scalar_prefetch = 0 : i64, scratch_operands = 0 : i64, tpu.core_type = #tpu.core_type<tc>, window_params = [{transform_indices = @transform_0, window_bounds = array<i64: 8, 4>}, {pipeline_mode = #tpu.pipeline_mode<synchronous>, transform_indices = @transform_1, window_bounds = array<i64: 4, 256>}, {transform_indices = @transform_2, window_bounds = array<i64: 8, 128>}]} {
    %c0 = arith.constant 0 : index
    %c0_0 = arith.constant 0 : index
    %0 = vector.load %arg1[%c0, %c0_0] : memref<8x4xf32, #tpu.memory_space<vmem>>, vector<8x4xf32>
    %c0_1 = arith.constant 0 : index
    %c0_2 = arith.constant 0 : index
    %1 = vector.load %arg2[%c0_1, %c0_2] : memref<4x256xf32, #tpu.memory_space<vmem>>, vector<4x256xf32>
    %cst = arith.constant dense<0.000000e+00> : vector<8x256xf32>
    %2 = tpu.matmul %0, %1, %cst {dimension_numbers = #tpu.dot_dimension_numbers<[1], [0], [0], [1], [0, 0, 1, 1], [], []>} : vector<8x4xf32>, vector<4x256xf32>, vector<8x256xf32> -> vector<8x256xf32>
    %3 = vector.extract_strided_slice %2 {offsets = [0, 0], sizes = [8, 128], strides = [1, 1]} : vector<8x256xf32> to vector<8x128xf32>
    %4 = vector.extract_strided_slice %2 {offsets = [0, 128], sizes = [8, 128], strides = [1, 1]} : vector<8x256xf32> to vector<8x128xf32>
    %5 = math.sin %4 : vector<8x128xf32>
    %6 = math.exp %3 : vector<8x128xf32>
    %7 = arith.mulf %5, %6 : vector<8x128xf32>
    %c0_3 = arith.constant 0 : index
    %c0_4 = arith.constant 0 : index
    %8 = vector.load %arg3[%c0_3, %c0_4] : memref<8x128xf32, #tpu.memory_space<vmem>>, vector<8x128xf32>
    tpu.vector_store %arg3[%c0_3, %c0_4], %7 {strides = array<i32>} : memref<8x128xf32, #tpu.memory_space<vmem>>, vector<8x128xf32>,
    return
  }
  func.func @transform_0(%arg0: i32) -> (i32, i32) {
    %c0_i32 = arith.constant 0 : i32
    %c0_i32_0 = arith.constant 0 : i32
    return %arg0, %c0_i32 : i32, i32
  }
  func.func @transform_1(%arg0: i32) -> (i32, i32) {
    %c0_i32 = arith.constant 0 : i32
    %c0_i32_0 = arith.constant 0 : i32
    %c0_i32_1 = arith.constant 0 : i32
    return %c0_i32, %c0_i32_0 : i32, i32
  }
  func.func @transform_2(%arg0: i32) -> (i32, i32) {
    %c0_i32 = arith.constant 0 : i32
    %c0_i32_0 = arith.constant 0 : i32
    return %arg0, %c0_i32 : i32, i32
  }
}

</mosaic_0001>

<bundles_post_ra>
// kernel: herglotz_pe_forward.1
= control target key start
LH: loop header
LB: loop body
LE: loop exit
PB: predicated region body
PF: predicated region fallthrough
CT: control target
= control target key end

     0   :  { %s381_s0 = inlined_call_operand.vmem [shape: f32[8,4], index: 0, kind: input, shape index: {}]   ;;  %s382_s1 = inlined_call_operand.vmem [shape: f32[4,256], index: 1, kind: input, shape index: {}]   ;;  %s383_s2 = inlined_call_operand.hbm [shape: f32[8,128], index: 2, kind: output, shape index: {}]  }
   0x1   :  { %v13_v0 = vld [vmem:[%s382_s1] sm:$0xff] }
   0x2   :  { %7 = vsyncpa [#allocation3], 0  ;;  %15 = vst [vmem:[#allocation1] ss:$2 sm:$0xff] %v13_v0  ;;  %vm22_vm0 = vcmask 1043456   ;;  %v12_v1 = vld [vmem:[%s381_s0] sm:$0xff] }
   0x3   :  { %vm18_vm1 = vcmask 31744   ;;  %v285_v16 = vmov 683565275   ;;  %v286_v18 = vmov 2475754826   ;;  %v291_v0 = vmov 0  }
   0x4   :  { %v287_v21 = vmov 2131351028   ;;  %v288_v24 = vmov 2102212464   ;;  %v289_v27 = vmov 920167782  }
   0x5   :  { %v290_v30 = vmov 1326507024   ;;  %s292_s0 = smov [#allocation2]   ;;  %s233_s15 = sshll.u32 %s383_s2, 4  ;;  %s234_s15 = int_to_ptr.hbm [resolvable:$true] %s233_s15 }
   0x6   :  { %s231_s1 = sshll.u32 %s292_s0, 4  ;;  %s232_s1 = int_to_ptr.vmem [resolvable:$true] %s231_s1 }
   0x9   :  { %v17_v2 = vld.sshfl [vmem:[#allocation1 + $0x8] sm:$0xff pattern:$0x75316420]  ;;  %v16_v3 = vld.sshfl [vmem:[#allocation1] sm:$0xff pattern:$0x75316420] }
   0xa   :  { %244 = vmatpush.msk.msra.mxu1 %vm22_vm0, %v17_v2  ;;  %242 = vmatpush.msk.msra.mxu0 %vm22_vm0, %v16_v3 }
   0xb   :  { %245 = vmatmul.msk.f32.vlgmr.msra.gmra.mxu1 %vm18_vm1, %v12_v1  ;;  %243 = vmatmul.msk.f32.vlgmr.msra.gmra.mxu0 %vm18_vm1, %v12_v1 }
  0x88   :  { %v314_v4 = vpop.f32.mrf.mxu1 }
  0x89   :  { %v70_v5 = vand.u32 2139095040, %v314_v4  ;;  %v67_v8 = vand.u32 2147483647, %v314_v4  ;;  %vm69_vm14 = vcmp.lt.s32.totalorder %v314_v4, 0 }
  0x8b   :  { %v71_v6 = vshrl.u32 %v70_v5, 23  ;;  %v74_v10 = vand.u32 8388607, %v67_v8  ;;  %vm368_vm15 = vcmp.le.f32.partialorder %v67_v8, 0.7853982 }
  0x8d   :  { %v246_v7 = vadd.s32 4294967169, %v71_v6  ;;  %v75_v14 = vor.u32 8388608, %v74_v10 }
  0x8f   :  { %v77_v9 = vadd.s32 1, %v246_v7  ;;  %v331_v37 = vshll.u32 %v75_v14, 8 }
  0x91   :  { %vm78_vm2 = vcmp.gt.s32.totalorder %v77_v9, 0  ;;  %v116_v46 = vand.u32 65535, %v331_v37  ;;  %v117_v47 = vshrl.u32 %v331_v37, 16 }
  0x92   :  { %v79_v11 = vsel %vm78_vm2, %v77_v9, 0 }
  0x93   :  { %v81_v12 = vand.u32 31, %v79_v11  ;;  %v322_v15 = vshrl.u32 %v79_v11, 5 }
  0x95   :  { %v320_v13 = vsub.s32 32, %v81_v12  ;;  %v84_v17 = vshll.u32 %v285_v16, %v81_v12  ;;  %v87_v19 = vshll.u32 %v286_v18, %v81_v12  ;;  %v90_v23 = vshll.u32 %v287_v21, %v81_v12 }
  0x96   :  { %v93_v26 = vshll.u32 %v288_v24, %v81_v12  ;;  %v96_v29 = vshll.u32 %v289_v27, %v81_v12  ;;  %vm99_vm3 = vcmp.lt.s32.totalorder %v322_v15, 1  ;;  %vm102_vm4 = vcmp.lt.s32.totalorder %v322_v15, 4 }
  0x97   :  { %v85_v20 = vshrl.u32 %v286_v18, %v320_v13  ;;  %v88_v22 = vshrl.u32 %v287_v21, %v320_v13  ;;  %v91_v25 = vshrl.u32 %v288_v24, %v320_v13  ;;  %v94_v28 = vshrl.u32 %v289_v27, %v320_v13 }
  0x98   :  { %v97_v31 = vshrl.u32 %v290_v30, %v320_v13  ;;  %vm101_vm5 = vcmp.lt.s32.totalorder %v322_v15, 3  ;;  %vm100_vm6 = vcmp.lt.s32.totalorder %v322_v15, 2  ;;  %v83_v11 = vshrl.u32 %v285_v16, %v320_v13 }
  0x99   :  { %v86_v32 = vor.u32 %v85_v20, %v84_v17  ;;  %v89_v33 = vor.u32 %v88_v22, %v87_v19  ;;  %v92_v34 = vor.u32 %v91_v25, %v90_v23  ;;  %v95_v35 = vor.u32 %v94_v28, %v93_v26 }
  0x9a   :  { %v98_v36 = vor.u32 %v97_v31, %v96_v29 }
  0x9b   :  { %v107_v38 = vsel %vm99_vm3, %v86_v32, %v89_v33  ;;  %v111_v39 = vsel %vm99_vm3, %v89_v33, %v92_v34  ;;  %v108_v40 = vsel %vm102_vm4, %v95_v35, 920167782  ;;  %v104_v7 = vsel %vm102_vm4, %v92_v34, 2102212464 }
  0x9c   :  { %v112_v41 = vsel %vm102_vm4, %v98_v36, 1326507024  ;;  %v109_v42 = vsel %vm101_vm5, %v92_v34, %v108_v40  ;;  %v103_v20 = vsel %vm99_vm3, %v83_v11, %v86_v32  ;;  %v105_v21 = vsel %vm101_vm5, %v89_v33, %v104_v7 }
  0x9d   :  { %v113_v43 = vsel %vm101_vm5, %v95_v35, %v112_v41  ;;  %v110_v44 = vsel %vm100_vm6, %v107_v38, %v109_v42  ;;  %v106_v13 = vsel %vm100_vm6, %v103_v20, %v105_v21  ;;  %vm210_vm3 = vweird.f32 %v314_v4 }
  0x9e   :  { %v114_v45 = vsel %vm100_vm6, %v111_v39, %v113_v43  ;;  %v140_v50 = vand.u32 65535, %v110_v44  ;;  %v141_v51 = vshrl.u32 %v110_v44, 16  ;;  %v160_v29 = vmul.u32 %v331_v37, %v106_v13 }
  0x9f   :  { %v118_v48 = vand.u32 65535, %v114_v45  ;;  %v119_v49 = vshrl.u32 %v114_v45, 16 }
  0xa0   :  { %v143_v54 = vmul.u32 %v141_v51, %v116_v46  ;;  %v144_v55 = vmul.u32 %v140_v50, %v117_v47  ;;  %v142_v59 = vmul.u32 %v140_v50, %v116_v46  ;;  %v145_v63 = vmul.u32 %v141_v51, %v117_v47 }
  0xa1   :  { %v121_v52 = vmul.u32 %v119_v49, %v116_v46  ;;  %v122_v53 = vmul.u32 %v118_v48, %v117_v47  ;;  %v120_v56 = vmul.u32 %v118_v48, %v116_v46  ;;  %v123_v58 = vmul.u32 %v119_v49, %v117_v47 }
  0xa2   :  { %v146_v60 = vshll.u32 %v143_v54, 16  ;;  %v148_v2 = vshll.u32 %v144_v55, 16  ;;  %v147_v18 = vshrl.u32 %v143_v54, 16  ;;  %v149_v24 = vshrl.u32 %v144_v55, 16 }
  0xa3   :  { %v124_v57 = vshll.u32 %v121_v52, 16  ;;  %v126_v61 = vshll.u32 %v122_v53, 16  ;;  %v125_v12 = vshrl.u32 %v121_v52, 16  ;;  %v127_v22 = vshrl.u32 %v122_v53, 16 }
  0xa4   :  { %vm150_vm8 = vc.u32 %v142_v59, %v146_v60  ;;  %v152_v3 = vadd.s32 %v146_v60, %v142_v59 }
  0xa5   :  { %vm128_vm7 = vc.u32 %v120_v56, %v124_v57  ;;  %v130_v62 = vadd.s32 %v124_v57, %v120_v56  ;;  %v151_v6 = vsel %vm150_vm8, 1, %v291_v0 }
  0xa6   :  { %v129_v1 = vsel %vm128_vm7, 1, %v291_v0  ;;  %v153_v10 = vadd.s32 %v151_v6, %v145_v63  ;;  %vm154_vm10 = vc.u32 %v152_v3, %v148_v2  ;;  %v156_v27 = vadd.s32 %v152_v3, %v148_v2  ;;  %v44_v63 = vpop.f32.mrf.mxu0 }
  0xa7   :  { %v131_v5 = vadd.s32 %v129_v1, %v123_v58  ;;  %vm132_vm9 = vc.u32 %v130_v62, %v126_v61  ;;  %v155_v17 = vsel %vm154_vm10, 1, %v291_v0  ;;  %v222_v3 = vmul.f32 1.442695, %v44_v63 }
  0xa8   :  { %v133_v9 = vsel %vm132_vm9, 1, %v291_v0  ;;  %v157_v19 = vadd.s32 %v155_v17, %v153_v10 }
  0xa9   :  { %v135_v14 = vadd.s32 %v133_v9, %v131_v5  ;;  %257 = vpow2.f32 %v222_v3 }
  0xaa   :  { %v158_v25 = vadd.s32 %v157_v19, %v147_v18 }
  0xab   :  { %v136_v23 = vadd.s32 %v135_v14, %v125_v12 }
  0xac   :  { %v159_v16 = vadd.s32 %v158_v25, %v149_v24 }
  0xad   :  { %v137_v26 = vadd.s32 %v136_v23, %v127_v22 }
  0xae   :  { %v163_v28 = vadd.s32 1, %v159_v16 }
  0xaf   :  { %vm162_vm11 = vc.u32 %v137_v26, %v156_v27  ;;  %v161_v15 = vadd.s32 %v156_v27, %v137_v26  ;;  %v258_v19 = vpop.eup %257 }
  0xb0   :  { %v164_v30 = vsel %vm162_vm11, %v163_v28, %v159_v16 }
  0xb1   :  { %v165_v31 = vadd.s32 %v164_v30, %v160_v29 }
  0xb3   :  { %v166_v32 = vadd.s32 536870912, %v165_v31 }
  0xb5   :  { %v167_v34 = vshrl.u32 %v166_v32, 30 }
  0xb7   :  { %v168_v35 = vshll.u32 %v167_v34, 30  ;;  %v191_v55 = vsub.s32 4, %v167_v34 }
  0xb9   :  { %v169_v33 = vsub.s32 %v165_v31, %v168_v35  ;;  %v192_v60 = vsel %vm69_vm14, %v191_v55, %v167_v34 }
  0xba   :  { %v194_v0 = vsel %vm368_vm15, 0, %v192_v60 }
  0xbb   :  { %vm170_vm12 = vcmp.lt.s32.totalorder %v169_v33, 0  ;;  %v171_v36 = vsub.s32 0, %v169_v33  ;;  %v211_v6 = vadd.s32 3, %v194_v0 }
  0xbd   :  { %v172_v38 = vsel %vm170_vm12, %v171_v36, %v169_v33  ;;  %v212_v12 = vand.u32 3, %v211_v6 }
  0xbe   :  { %v173_v39 = vclz %v172_v38 }
  0xbf   :  { %vm214_vm0 = vcmp.eq.s32.totalorder %v212_v12, 0  ;;  %vm217_vm1 = vcmp.eq.s32.totalorder %v212_v12, 2  ;;  %vm213_vm2 = vcmp.lt.s32.totalorder %v212_v12, 2 }
  0xc0   :  { %v247_v40 = vadd.s32 4294967294, %v173_v39 }
  0xc2   :  { %vm248_vm13 = vcmp.lt.s32.totalorder %v247_v40, 0 }
  0xc3   :  { %v176_v41 = vsel %vm248_vm13, 0, %v247_v40 }
  0xc4   :  { %v177_v42 = vsub.s32 32, %v176_v41  ;;  %v181_v43 = vsub.s32 4294967266, %v176_v41  ;;  %v178_v44 = vshll.u32 %v169_v33, %v176_v41 }
  0xc6   :  { %v179_v45 = vshrl.u32 %v161_v15, %v177_v42  ;;  %v182_v46 = vadd.s32 127, %v181_v43 }
  0xc8   :  { %v180_v37 = vor.u32 %v179_v45, %v178_v44  ;;  %v183_v47 = vshll.u32 %v182_v46, 23 }
  0xca   :  { %v184_v48 = vor.u32 4788187, %v183_v47  ;;  %v187_v50 = vcvt.s32.f32 %v180_v37 }
  0xcc   :  { %v185_v49 = vand.u32 2147483647, %v184_v48 }
  0xce   :  { %v188_v51 = vmul.f32 %v187_v50, %v185_v49 }
  0xd0   :  { %v189_v52 = vxor.u32 2147483648, %v188_v51 }
  0xd2   :  { %v190_v54 = vsel %vm69_vm14, %v189_v52, %v188_v51 }
  0xd3   :  { %v193_v56 = vsel %vm368_vm15, %v314_v4, %v190_v54 }
  0xd4   :  { %v195_v57 = vmul.f32 %v193_v56, %v193_v56 }
  0xd6   :  { %v203_v58 = vmul.f32 -0.00019511016, %v195_v57  ;;  %v196_v59 = vmul.f32 -0.001358992, %v195_v57 }
  0xd8   :  { %v204_v61 = vadd.f32 0.008332121, %v203_v58  ;;  %v197_v62 = vadd.f32 0.041655596, %v196_v59 }
  0xda   :  { %v205_v8 = vmul.f32 %v204_v61, %v195_v57  ;;  %v198_v1 = vmul.f32 %v197_v62, %v195_v57 }
  0xdc   :  { %v206_v2 = vadd.f32 -0.16666654, %v205_v8  ;;  %v199_v5 = vadd.f32 -0.4999988, %v198_v1 }
  0xde   :  { %v207_v7 = vmul.f32 %v206_v2, %v195_v57  ;;  %v200_v9 = vmul.f32 %v199_v5, %v195_v57 }
  0xe0   :  { %v208_v10 = vadd.f32 1.0, %v207_v7  ;;  %v201_v11 = vadd.f32 1.0, %v200_v9 }
  0xe2   :  { %v209_v14 = vmul.f32 %v208_v10, %v193_v56  ;;  %v218_v17 = vxor.u32 2147483648, %v201_v11 }
  0xe4   :  { %v215_v18 = vxor.u32 2147483648, %v209_v14  ;;  %v219_v21 = vsel %vm217_vm1, %v218_v17, %v209_v14 }
  0xe6   :  { %v216_v20 = vsel %vm214_vm0, %v201_v11, %v215_v18 }
  0xe7   :  { %v220_v22 = vsel %vm213_vm2, %v216_v20, %v219_v21 }
  0xe8   :  { %v221_v23 = vsel %vm210_vm3, nan, %v220_v22 }
  0xe9   :  { %v224_v24 = vmul.f32 %v258_v19, %v221_v23 }
  0xeb   :  { %225 = vst [vmem:[#allocation2] sm:$0xff] %v224_v24 }
  0xec   :  { %236 = dma.vmem_to_hbm [thread:$0]  %s232_s1, 128, %s234_s15, [#allocation3]  }
  0xed   :  { %283 = dma.done.wait [#allocation3], 128  }
  0xee   :  { %284 = vsyncadd [#allocation3], 4294967168 }
  0xef   :  { %241 = vsyncpa [#allocation3], 1 }

</bundles_post_ra>
